<compile_context>
chip_gen: v6e
topology: v6e:2x2x1
jax: 0.10.0
libtpu: 0.0.40
codegen_flags: <defaults>
</compile_context>

<pallas_src>
import functools

import jax
import jax.numpy as jnp
from jax.experimental import pallas as pl
from jax.experimental.pallas import tpu as pltpu


def _sobel_edge_kernel(prev_ref, curr_ref, next_ref, out_ref, *, img_h):
    t, w = out_ref.shape                      # TILE_H, W (static)
    ti = pl.program_id(1)
    t0 = ti * t                               # first image row of this tile
    f32 = jnp.float32
    use_roll = (w % 128) == 0                 # lane-aligned fast path

    # ---- assemble the (TILE_H + 16, W) working window ------------------------
    # Halo rows outside the image act as the Gaussian's zero padding; rows at /
    # past the image bottom (clamped duplicate halo blocks, or garbage from a
    # partial last block) are zeroed with selects (safe even for NaN/Inf OOB data).
    prev = prev_ref[...]
    prev = jnp.where(ti > 0, prev, jnp.zeros_like(prev))
    nxt = next_ref[...]
    nrow = jax.lax.broadcasted_iota(jnp.int32, (8, 1), 0)
    nxt = jnp.where(t0 + t + nrow < img_h, nxt, jnp.zeros_like(nxt))
    curr = curr_ref[...]
    if img_h % t != 0:                        # only traced when tiles can overhang
        crow = jax.lax.broadcasted_iota(jnp.int32, (t, 1), 0)
        curr = jnp.where(t0 + crow < img_h, curr, jnp.zeros_like(curr))

    # Stacked plane: row k <-> image row t0 - 8 + k.  Concatenate in the input
    # dtype, upcast to f32 once in VMEM.
    xt = jnp.concatenate([prev, curr, nxt], axis=0).astype(f32)

    # Shift helpers.  Interior semantics: hshift(a, -1)[:, c] = a[:, c + 1] and
    # vshift(a, -1)[k] = a[k + 1] (mirrored for +1).  Wrapped / zero-filled
    # boundary lanes & rows only reach output rows/cols the wrapper slices away
    # (the one exception, the Gaussian's horizontal taps, is corrected below),
    # and every direction-sensitive use is squared or symmetric, so the exact
    # roll direction convention cannot change the result.
    if use_roll:
        def hshift(a, s):
            return pltpu.roll(a, s, axis=1)

        def vshift(a, s):
            return pltpu.roll(a, s, axis=0)
    else:
        def hshift(a, s):
            zc = jnp.zeros_like(a[:, :1])
            return (jnp.concatenate([a[:, 1:], zc], axis=1) if s == -1
                    else jnp.concatenate([zc, a[:, :-1]], axis=1))

        def vshift(a, s):
            zr = jnp.zeros_like(a[:1])
            return (jnp.concatenate([a[1:], zr], axis=0) if s == -1
                    else jnp.concatenate([zr, a[:-1]], axis=0))

    # ---- Gaussian 3x3 (unnormalized: all-ones + 3*center), zero padding ------
    h3 = hshift(xt, -1) + hshift(xt, 1) + xt
    if use_roll:
        # Rolls wrap around; subtract whatever wrapped into the two image-edge
        # columns so they see zero padding (independent of roll direction).
        lane = jax.lax.broadcasted_iota(jnp.int32, (1, w), 1)
        h3 = h3 - (jnp.where(lane == 0, xt[:, w - 1:], 0.0)
                   + jnp.where(lane == w - 1, xt[:, :1], 0.0))
    e = vshift(h3, 1) + h3 + vshift(h3, -1) + 3.0 * xt      # = 16 * elev

    # ---- Sobel 3x3 (unnormalized), separable; shifts of e computed once ------
    el = hshift(e, -1)
    er = hshift(e, 1)
    dh = el - er                       # -> gx after the [1, 2, 1] row tap
    sh = el + 2.0 * e + er             # -> gy after the [-1, 0, 1] row tap
    gx = vshift(dh, 1) + 2.0 * dh + vshift(dh, -1)
    gy = vshift(sh, -1) - vshift(sh, 1)

    # ---- square, clamp, single deferred scale ((1/16)^2 * (1/8)^2) -----------
    gx = gx[8:t + 8]                   # 8-aligned slice back to the tile rows
    gy = gy[8:t + 8]
    edge = jnp.clip((gx * gx + gy * gy) * (1.0 / 16384.0), 0.0, 1.0)
    out_ref[...] = edge.astype(out_ref.dtype)


def _vmem_limit_bytes():
    """Scoped-VMEM limit: ~60% of physical VMEM, capped so a budget tuned on
    v5e/v6e (128 MiB) still fits v7x's 64 MiB per TensorCore."""
    phys = 64 * 1024 * 1024
    try:
        phys = int(pltpu.get_tpu_info().vmem_capacity_bytes)
    except Exception:
        pass                                   # query unavailable -> stay conservative
    return max(32 * 1024 * 1024, min(phys * 6 // 10, 80 * 1024 * 1024))


def _pick_tile_h(b, h, w, vmem_limit):
    """Rows per tile.  Budget ~half the scoped-VMEM limit across ~9 live f32
    (TILE_H, W) planes (double-buffered in/out blocks + in-kernel temporaries);
    this lands each block at a few MiB -- enough to amortize the ~0.35 us per-step
    overhead and keep the 16-row halo reads a small fraction of traffic."""
    h8 = -(-h // 8) * 8
    plane_elems = (vmem_limit // 2) // (9 * 4)
    t = (plane_elems // max(w, 1)) // 8 * 8
    t = max(8, min(1024, t))
    t = min(t, h8)
    if b == 1 and h > 8:
        # Split the height so both v7x TensorCores get a row-tile even when one
        # big tile would fit VMEM ("parallel" grid dims shard across TCs).
        t = min(t, ((h + 1) // 2 + 7) // 8 * 8)
    return t


@jax.jit
def sobel_edge(x):
    """Pallas TPU SobelEdge forward.  x: (B, 1, H, W) -> (B, 1, H-2, W-2)."""
    b, c, h, w = x.shape
    if c != 1:
        # TODO(synk): nn.Conv2d(1, 1, ...) in the original forces C == 1; for C > 1
        # the module's concat is shape-inconsistent, so it is not modeled here.
        raise ValueError("SobelEdge requires a single input channel")

    vmem_limit = _vmem_limit_bytes()
    tile_h = _pick_tile_h(b, h, w, vmem_limit)
    n_t = pl.cdiv(h, tile_h)
    bpt = tile_h // 8                          # 8-row halo blocks per tile
    nblk8 = pl.cdiv(h, 8)

    in_specs = [
        # 8-row halo just above the tile (clamped at the top edge; zeroed in-kernel)
        pl.BlockSpec((None, None, 8, w),
                     lambda bi, ti: (bi, 0, jnp.maximum(ti * bpt - 1, 0), 0)),
        # current (TILE_H, W) tile
        pl.BlockSpec((None, None, tile_h, w), lambda bi, ti: (bi, 0, ti, 0)),
        # 8-row halo just below the tile (clamped at the bottom edge; zeroed in-kernel)
        pl.BlockSpec((None, None, 8, w),
                     lambda bi, ti: (bi, 0, jnp.minimum((ti + 1) * bpt, nblk8 - 1), 0)),
    ]
    out_specs = pl.BlockSpec((None, tile_h, w), lambda bi, ti: (bi, ti, 0))

    out_full = pl.pallas_call(
        functools.partial(_sobel_edge_kernel, img_h=h),
        out_shape=jax.ShapeDtypeStruct((b, h, w), x.dtype),
        grid=(b, n_t),
        in_specs=in_specs,
        out_specs=out_specs,
        compiler_params=pltpu.CompilerParams(
            dimension_semantics=("parallel", "parallel"),
            vmem_limit_bytes=vmem_limit),
    )(x, x, x)

    # "same"-indexed edge slab -> the valid window of the padding-free Sobel conv.
    edge = out_full[:, 1:h - 1, 1:w - 1]
    return edge[:, None, :, :]


def _reference(x):
    """Plain-JAX reference identical to the PyTorch module (for verification)."""
    g = jnp.array([[1., 1., 1.], [1., 4., 1.], [1., 1., 1.]], jnp.float32) / 16.0
    kx = jnp.array([[-1., 0., 1.], [-2., 0., 2.], [-1., 0., 1.]], jnp.float32) / 8.0
    ky = jnp.array([[-1., -2., -1.], [0., 0., 0.], [1., 2., 1.]], jnp.float32) / 8.0

    def corr(img, k, pad):
        return jax.lax.conv_general_dilated(
            img, k[None, None], window_strides=(1, 1),
            padding=[(pad, pad), (pad, pad)],
            dimension_numbers=("NCHW", "OIHW", "NCHW"))

    elev = corr(x.astype(jnp.float32), g, 1)
    gx = corr(elev, kx, 0)
    gy = corr(elev, ky, 0)
    return jnp.clip(gx * gx + gy * gy, 0.0, 1.0)


if __name__ == "__main__":
    key = jax.random.PRNGKey(0)
    x = jax.random.normal(key, (2, 1, 16, 16), dtype=jnp.float32)

    out = jax.block_until_ready(sobel_edge(x))
    assert out.shape == (2, 1, 14, 14), out.shape

    ref = jax.block_until_ready(_reference(x))
    max_err = float(jnp.max(jnp.abs(out.astype(jnp.float32) - ref)))
    assert max_err < 2e-5, f"mismatch vs reference: {max_err}"

    print("KERNEL_OK")
</pallas_src>

<mosaic_0001>
module attributes {stable_mosaic.version = 11 : i64} {
  func.func @_sobel_edge_kernel(%arg0: i32, %arg1: i32, %arg2: memref<1x1x8x16xf32, #tpu.memory_space<vmem>>, %arg3: memref<1x1x16x16xf32, #tpu.memory_space<vmem>>, %arg4: memref<1x1x8x16xf32, #tpu.memory_space<vmem>>, %arg5: memref<1x16x16xf32, #tpu.memory_space<vmem>>) attributes {dimension_semantics = [#tpu.dimension_semantics<parallel>, #tpu.dimension_semantics<parallel>], iteration_bounds = array<i64: 2, 1>, scalar_prefetch = 0 : i64, scratch_operands = 0 : i64, tpu.core_type = #tpu.core_type<tc>, window_params = [{transform_indices = @transform_0, window_bounds = array<i64: 1, 1, 8, 16>}, {transform_indices = @transform_1, window_bounds = array<i64: 1, 1, 16, 16>}, {transform_indices = @transform_2, window_bounds = array<i64: 1, 1, 8, 16>}, {transform_indices = @transform_3, window_bounds = array<i64: 1, 16, 16>}]} {
    %c16_i32 = arith.constant 16 : i32
    %0 = arith.muli %arg1, %c16_i32 : i32
    %c0 = arith.constant 0 : index
    %c0_0 = arith.constant 0 : index
    %c0_1 = arith.constant 0 : index
    %c0_2 = arith.constant 0 : index
    %1 = vector.load %arg2[%c0, %c0_0, %c0_1, %c0_2] : memref<1x1x8x16xf32, #tpu.memory_space<vmem>>, vector<1x1x8x16xf32>
    %2 = vector.shape_cast %1 : vector<1x1x8x16xf32> to vector<8x16xf32>
    %c0_i32 = arith.constant 0 : i32
    %3 = arith.cmpi sgt, %arg1, %c0_i32 : i32
    %cst = arith.constant 0.000000e+00 : f32
    %4 = vector.broadcast %cst : f32 to vector<8x16xf32>
    %5 = arith.select %3, %2, %4 : vector<8x16xf32>
    %c0_3 = arith.constant 0 : index
    %c0_4 = arith.constant 0 : index
    %c0_5 = arith.constant 0 : index
    %c0_6 = arith.constant 0 : index
    %6 = vector.load %arg4[%c0_3, %c0_4, %c0_5, %c0_6] : memref<1x1x8x16xf32, #tpu.memory_space<vmem>>, vector<1x1x8x16xf32>
    %7 = vector.shape_cast %6 : vector<1x1x8x16xf32> to vector<8x16xf32>
    %8 = tpu.iota {dimensions = array<i32: 0>} : vector<8x1xi32>
    %c16_i32_7 = arith.constant 16 : i32
    %9 = arith.addi %0, %c16_i32_7 : i32
    %10 = vector.broadcast %9 : i32 to vector<8x1xi32>
    %11 = arith.addi %10, %8 : vector<8x1xi32>
    %c16_i32_8 = arith.constant 16 : i32
    %12 = vector.broadcast %c16_i32_8 : i32 to vector<8x1xi32>
    %13 = arith.cmpi slt, %11, %12 : vector<8x1xi32>
    %cst_9 = arith.constant 0.000000e+00 : f32
    %14 = vector.broadcast %cst_9 : f32 to vector<8x16xf32>
    %15 = vector.shape_cast %13 : vector<8x1xi1> to vector<8x1xi1>
    %16 = vector.broadcast %15 : vector<8x1xi1> to vector<8x16xi1>
    %17 = arith.select %16, %7, %14 : vector<8x16xi1>, vector<8x16xf32>
    %c0_10 = arith.constant 0 : index
    %c0_11 = arith.constant 0 : index
    %c0_12 = arith.constant 0 : index
    %c0_13 = arith.constant 0 : index
    %18 = vector.load %arg3[%c0_10, %c0_11, %c0_12, %c0_13] : memref<1x1x16x16xf32, #tpu.memory_space<vmem>>, vector<1x1x16x16xf32>
    %19 = vector.shape_cast %18 : vector<1x1x16x16xf32> to vector<16x16xf32>
    %20 = tpu.concatenate %5, %19, %17 in 0 : vector<8x16xf32>, vector<16x16xf32>, vector<8x16xf32> -> vector<32x16xf32>
    %cst_14 = arith.constant 0.000000e+00 : f32
    %21 = vector.broadcast %cst_14 : f32 to vector<32x1xf32>
    %22 = vector.extract_strided_slice %20 {offsets = [0, 1], sizes = [32, 15], strides = [1, 1]} : vector<32x16xf32> to vector<32x15xf32>
    %23 = tpu.concatenate %22, %21 in 1 : vector<32x15xf32>, vector<32x1xf32> -> vector<32x16xf32>
    %cst_15 = arith.constant 0.000000e+00 : f32
    %24 = vector.broadcast %cst_15 : f32 to vector<32x1xf32>
    %25 = vector.extract_strided_slice %20 {offsets = [0, 0], sizes = [32, 15], strides = [1, 1]} : vector<32x16xf32> to vector<32x15xf32>
    %26 = tpu.concatenate %24, %25 in 1 : vector<32x1xf32>, vector<32x15xf32> -> vector<32x16xf32>
    %27 = arith.addf %23, %26 : vector<32x16xf32>
    %28 = arith.addf %27, %20 : vector<32x16xf32>
    %cst_16 = arith.constant 0.000000e+00 : f32
    %29 = vector.broadcast %cst_16 : f32 to vector<1x16xf32>
    %30 = vector.extract_strided_slice %28 {offsets = [0, 0], sizes = [31, 16], strides = [1, 1]} : vector<32x16xf32> to vector<31x16xf32>
    %31 = tpu.concatenate %29, %30 in 0 : vector<1x16xf32>, vector<31x16xf32> -> vector<32x16xf32>
    %32 = arith.addf %31, %28 : vector<32x16xf32>
    %cst_17 = arith.constant 0.000000e+00 : f32
    %33 = vector.broadcast %cst_17 : f32 to vector<1x16xf32>
    %34 = vector.extract_strided_slice %28 {offsets = [1, 0], sizes = [31, 16], strides = [1, 1]} : vector<32x16xf32> to vector<31x16xf32>
    %35 = tpu.concatenate %34, %33 in 0 : vector<31x16xf32>, vector<1x16xf32> -> vector<32x16xf32>
    %36 = arith.addf %32, %35 : vector<32x16xf32>
    %cst_18 = arith.constant 3.000000e+00 : f32
    %37 = vector.broadcast %cst_18 : f32 to vector<32x16xf32>
    %38 = arith.mulf %37, %20 : vector<32x16xf32>
    %39 = arith.addf %36, %38 : vector<32x16xf32>
    %cst_19 = arith.constant 0.000000e+00 : f32
    %40 = vector.broadcast %cst_19 : f32 to vector<32x1xf32>
    %41 = vector.extract_strided_slice %39 {offsets = [0, 1], sizes = [32, 15], strides = [1, 1]} : vector<32x16xf32> to vector<32x15xf32>
    %42 = tpu.concatenate %41, %40 in 1 : vector<32x15xf32>, vector<32x1xf32> -> vector<32x16xf32>
    %cst_20 = arith.constant 0.000000e+00 : f32
    %43 = vector.broadcast %cst_20 : f32 to vector<32x1xf32>
    %44 = vector.extract_strided_slice %39 {offsets = [0, 0], sizes = [32, 15], strides = [1, 1]} : vector<32x16xf32> to vector<32x15xf32>
    %45 = tpu.concatenate %43, %44 in 1 : vector<32x1xf32>, vector<32x15xf32> -> vector<32x16xf32>
    %46 = arith.subf %42, %45 : vector<32x16xf32>
    %cst_21 = arith.constant 2.000000e+00 : f32
    %47 = vector.broadcast %cst_21 : f32 to vector<32x16xf32>
    %48 = arith.mulf %47, %39 : vector<32x16xf32>
    %49 = arith.addf %42, %48 : vector<32x16xf32>
    %50 = arith.addf %49, %45 : vector<32x16xf32>
    %cst_22 = arith.constant 0.000000e+00 : f32
    %51 = vector.broadcast %cst_22 : f32 to vector<1x16xf32>
    %52 = vector.extract_strided_slice %46 {offsets = [0, 0], sizes = [31, 16], strides = [1, 1]} : vector<32x16xf32> to vector<31x16xf32>
    %53 = tpu.concatenate %51, %52 in 0 : vector<1x16xf32>, vector<31x16xf32> -> vector<32x16xf32>
    %cst_23 = arith.constant 2.000000e+00 : f32
    %54 = vector.broadcast %cst_23 : f32 to vector<32x16xf32>
    %55 = arith.mulf %54, %46 : vector<32x16xf32>
    %56 = arith.addf %53, %55 : vector<32x16xf32>
    %cst_24 = arith.constant 0.000000e+00 : f32
    %57 = vector.broadcast %cst_24 : f32 to vector<1x16xf32>
    %58 = vector.extract_strided_slice %46 {offsets = [1, 0], sizes = [31, 16], strides = [1, 1]} : vector<32x16xf32> to vector<31x16xf32>
    %59 = tpu.concatenate %58, %57 in 0 : vector<31x16xf32>, vector<1x16xf32> -> vector<32x16xf32>
    %60 = arith.addf %56, %59 : vector<32x16xf32>
    %cst_25 = arith.constant 0.000000e+00 : f32
    %61 = vector.broadcast %cst_25 : f32 to vector<1x16xf32>
    %62 = vector.extract_strided_slice %50 {offsets = [1, 0], sizes = [31, 16], strides = [1, 1]} : vector<32x16xf32> to vector<31x16xf32>
    %63 = tpu.concatenate %62, %61 in 0 : vector<31x16xf32>, vector<1x16xf32> -> vector<32x16xf32>
    %cst_26 = arith.constant 0.000000e+00 : f32
    %64 = vector.broadcast %cst_26 : f32 to vector<1x16xf32>
    %65 = vector.extract_strided_slice %50 {offsets = [0, 0], sizes = [31, 16], strides = [1, 1]} : vector<32x16xf32> to vector<31x16xf32>
    %66 = tpu.concatenate %64, %65 in 0 : vector<1x16xf32>, vector<31x16xf32> -> vector<32x16xf32>
    %67 = arith.subf %63, %66 : vector<32x16xf32>
    %68 = vector.extract_strided_slice %60 {offsets = [8, 0], sizes = [16, 16], strides = [1, 1]} : vector<32x16xf32> to vector<16x16xf32>
    %69 = vector.extract_strided_slice %67 {offsets = [8, 0], sizes = [16, 16], strides = [1, 1]} : vector<32x16xf32> to vector<16x16xf32>
    %70 = arith.mulf %68, %68 : vector<16x16xf32>
    %71 = arith.mulf %69, %69 : vector<16x16xf32>
    %72 = arith.addf %70, %71 : vector<16x16xf32>
    %cst_27 = arith.constant 6.10351563E-5 : f32
    %73 = vector.broadcast %cst_27 : f32 to vector<16x16xf32>
    %74 = arith.mulf %72, %73 : vector<16x16xf32>
    %cst_28 = arith.constant 0.000000e+00 : f32
    %cst_29 = arith.constant 1.000000e+00 : f32
    %75 = vector.broadcast %cst_28 : f32 to vector<16x16xf32>
    %76 = arith.maximumf %75, %74 : vector<16x16xf32>
    %77 = vector.broadcast %cst_29 : f32 to vector<16x16xf32>
    %78 = arith.minimumf %77, %76 : vector<16x16xf32>
    %c0_30 = arith.constant 0 : index
    %c0_31 = arith.constant 0 : index
    %c0_32 = arith.constant 0 : index
    %79 = vector.load %arg5[%c0_30, %c0_31, %c0_32] : memref<1x16x16xf32, #tpu.memory_space<vmem>>, vector<1x16x16xf32>
    %80 = vector.shape_cast %79 : vector<1x16x16xf32> to vector<16x16xf32>
    %81 = vector.shape_cast %78 : vector<16x16xf32> to vector<1x16x16xf32>
    tpu.vector_store %arg5[%c0_30, %c0_31, %c0_32], %81 {strides = array<i32>} : memref<1x16x16xf32, #tpu.memory_space<vmem>>, vector<1x16x16xf32>,
    return
  }
  func.func @transform_0(%arg0: i32, %arg1: i32) -> (i32, i32, i32, i32) {
    %c2_i32 = arith.constant 2 : i32
    %0 = arith.muli %arg1, %c2_i32 : i32
    %c1_i32 = arith.constant 1 : i32
    %1 = arith.subi %0, %c1_i32 : i32
    %c0_i32 = arith.constant 0 : i32
    %2 = arith.maxsi %1, %c0_i32 : i32
    %c0_i32_0 = arith.constant 0 : i32
    %c0_i32_1 = arith.constant 0 : i32
    %c0_i32_2 = arith.constant 0 : i32
    return %arg0, %c0_i32_0, %2, %c0_i32_1 : i32, i32, i32, i32
  }
  func.func @transform_1(%arg0: i32, %arg1: i32) -> (i32, i32, i32, i32) {
    %c0_i32 = arith.constant 0 : i32
    %c0_i32_0 = arith.constant 0 : i32
    %c0_i32_1 = arith.constant 0 : i32
    return %arg0, %c0_i32, %arg1, %c0_i32_0 : i32, i32, i32, i32
  }
  func.func @transform_2(%arg0: i32, %arg1: i32) -> (i32, i32, i32, i32) {
    %c1_i32 = arith.constant 1 : i32
    %0 = arith.addi %arg1, %c1_i32 : i32
    %c2_i32 = arith.constant 2 : i32
    %1 = arith.muli %0, %c2_i32 : i32
    %c1_i32_0 = arith.constant 1 : i32
    %2 = arith.minsi %1, %c1_i32_0 : i32
    %c0_i32 = arith.constant 0 : i32
    %c0_i32_1 = arith.constant 0 : i32
    %c0_i32_2 = arith.constant 0 : i32
    return %arg0, %c0_i32, %2, %c0_i32_1 : i32, i32, i32, i32
  }
  func.func @transform_3(%arg0: i32, %arg1: i32) -> (i32, i32, i32) {
    %c0_i32 = arith.constant 0 : i32
    %c0_i32_0 = arith.constant 0 : i32
    return %arg0, %arg1, %c0_i32 : i32, i32, i32
  }
}

</mosaic_0001>

<bundles_post_ra>
// kernel: sobel_edge.1
= control target key start
LH: loop header
LB: loop body
LE: loop exit
PB: predicated region body
PF: predicated region fallthrough
CT: control target
= control target key end

     0   :  { %8 = vsyncpa [#allocation3], 0  ;;  %s1151_s0 = inlined_call_operand.hbm [shape: f32[2,1,16,16], index: 0, kind: input, shape index: {}, may-alias: {0,1,2}]   ;;  %s1152_s1 = inlined_call_operand.hbm [shape: f32[2,1,16,16], index: 1, kind: input, shape index: {}, may-alias: {0,1,2}]   ;;  %s1153_s2 = inlined_call_operand.hbm [shape: f32[2,1,16,16], index: 2, kind: input, shape index: {}, may-alias: {0,1,2}]   ;;  %s1154_s3 = inlined_call_operand.vmem [shape: f32[2,16,16], index: 3, kind: output, shape index: {}]  }
   0x1   :  { %10 = vsyncpa [#allocation3 + $0x1], 0 }
   0x2   :  { %11 = vsyncpa [#allocation5], 0 }
   0x3   :  { %13 = vsyncpa [#allocation5 + $0x1], 0  ;;  %s964_s12 = smov 0   ;;  %s966_s13 = smov 0  }
   0x4   :  { %s968_s14 = smov 0   ;;  %s970_s15 = smov 0  }
   0x5   :  { %s972_s16 = smov 0   ;;  %s974_s17 = smov 0  }
   0x6 LB: > { %s694_s18 = sadd.s32 4294967295, %s934_s17   ;;  %s31_s19 = sadd.s32 1, %s930_s16  ;;  %s934_s17 = sphi %s974_s17, %s19_s17   ;;  %s930_s16 = sphi %s972_s16, %s1162_s16   ;;  %s926_s15 = sphi %s970_s15, %s1161_s15   ;;  %s922_s14 = sphi %s968_s14, %s1160_s14   ;;  %s918_s13 = sphi %s966_s13, %s1159_s13   ;;  %s914_s12 = sphi %s964_s12, %s1158_s12  }
   0x7   : > { %p33_p0 = scmp.ge.s32.totalorder %s31_s19, 2  ;;  %s48_s20 = sadd.s32 1, %s922_s14 }
   0x8   : > { %p55_p1 = scmp.ne.s32.totalorder %s922_s14, %s918_s13  ;;  %p56_p2 = scmp.eq.s32.totalorder %s934_s17, 0 }
   0x9   : > { %s1164_s19 = smov (%p33_p0, %s31_s19), 0  ;;  %p61_p4 = scmp.ne.s32.totalorder %s918_s13, %s914_s12 }
   0xa   : > { %p57_p3 = por %p56_p2, %p55_p1  ;;  %s43_s21 = ssub.s32 %s930_s16, %s1164_s19 }
   0xb   : > { %p62_p5 = scmp.eq.s32.totalorder %s694_s18, 0  ;;  %p46_p6 = scmp.eq.s32.totalorder %s43_s21, 0 }
   0xc   : > { %p737_p8 = scmp.lt.s32.totalorder %s934_s17, 2  ;;  %s1014_s24 = sand.u32 1, %s922_s14  }
   0xd   : > { %p1005_p7 = por %p62_p5, %p61_p4  ;;  %s1017_s25 = sshll.u32 %s930_s16, 8 }
   0xe   : > { %s1011_s23 = scalar_select %p46_p6, %s922_s14, %s48_s20  }
   0xf   : > { %p1019_p9 = pnand %p737_p8, %p57_p3  ;;  %s201_s27 = sand.u32 1, %s934_s17  }
  0x10   : > { %s701_s28 = sshll.u32 %s1014_s24, 4  ;;  %s213_s4 = scalar_lea.hbm %s1152_s1, %s1017_s25 }
  0x11   : > { %s205_s5 = scalar_lea.vmem [#allocation4], %s701_s28  ;;  %p707_p10 = scmp.ge.s32.totalorder %s934_s17, 1 }
  0x12   : > { %s214_s6 = sshll.u32 %s205_s5, 4  ;;  %s1030_s7 = scalar_lea.sflag [#allocation5], %s201_s27  ;;  %s215_s6 = int_to_ptr.vmem [resolvable:$true] %s214_s6 }
  0x13   : > { %p798_p11 = pneg %p1019_p9  ;;  %s809_s8 = scalar_lea.vmem %s215_s6, 256 }
  0x14   : > { %p810_p12 = scmp.ne.s32.totalorder %s215_s6, %s809_s8  ;;  %s936_s9 = smov [#allocation4]  }
  0x15   : > { %s814_s10 = sshll.u32 %s936_s9, 4  ;;  %s815_s10 = int_to_ptr.vmem [resolvable:$false] %s814_s10 }
  0x16   : > { %p812_p13 = pnand %p810_p12, %p798_p11  ;;  %s816_s11 = scalar_lea.vmem %s815_s10, 512 }
  0x17   : > { %p817_p1 = scmp.lt.s32.totalorder %s215_s6, %s815_s10  ;;  %p818_p2 = scmp.lt.s32.totalorder %s816_s11, %s809_s8 }
  0x18   : > { %p813_p0 = pneg %p812_p13 }
  0x19   : > { %p819_p3 = por %p818_p2, %p817_p1 }
  0x1b   : > { %p820_p4 = pnand %p819_p3, %p813_p0 }
  0x1d   : > { %823 = shalt.err (!%p820_p4)
}
  0x1e   : > { %s937_s12 = smov 128   ;;  %s938_s20 = smov 8  }
  0x1f   : > { %733 = dma.hbm_to_vmem [thread:$0]  (!%p1019_p9), %s213_s4, 256, %s215_s6, %s1030_s7, %s937_s12, %s937_s12, %s938_s20  }
  0x20   : > { %p246_p5 = scmp.lt.s32.totalorder %s934_s17, 3  ;;  %s698_s27 = sshll.u32 %s1014_s24, 3 }
  0x21   : > { %s192_s30 = scalar_lea.hbm %s1151_s0, %s1017_s25  ;;  %s181_s5 = scalar_lea.vmem [#allocation2], %s698_s27 }
  0x22   : > { %p1043_p6 = pnand %p707_p10, %p246_p5  ;;  %s194_s8 = sshll.u32 %s181_s5, 4  ;;  %s195_s8 = int_to_ptr.vmem [resolvable:$true] %s194_s8 }
  0x23   : > { %s718_s9 = sadd.s32 128, %s1017_s25  ;;  %s178_s10 = scalar_lea.sflag [#allocation3], %s1014_s24 }
  0x24   : > { %s837_s11 = scalar_lea.vmem %s195_s8, 128  ;;  %s939_s4 = smov [#allocation2]  }
  0x25   : > { %p838_p8 = scmp.ne.s32.totalorder %s195_s8, %s837_s11  ;;  %s842_s6 = sshll.u32 %s939_s4, 4  ;;  %s843_s6 = int_to_ptr.vmem [resolvable:$false] %s842_s6 }
  0x26   : > { %s844_s12 = scalar_lea.vmem %s843_s6, 256  ;;  %p845_p10 = scmp.lt.s32.totalorder %s195_s8, %s843_s6 }
  0x27   : > { %p840_p12 = pnand %p838_p8, %p798_p11  ;;  %p846_p0 = scmp.lt.s32.totalorder %s844_s12, %s837_s11 }
  0x29   : > { %p841_p13 = pneg %p840_p12  ;;  %p847_p1 = por %p846_p0, %p845_p10 }
  0x2b   : > { %p848_p2 = pnand %p847_p1, %p841_p13 }
  0x2d   : > { %851 = shalt.err (!%p848_p2)
}
  0x2e   : > { %730 = dma.hbm_to_vmem [thread:$0]  (!%p1019_p9), %s192_s30, 128, %s195_s8, %s178_s10  }
  0x2f   : > { %s239_s20 = scalar_lea.hbm %s1153_s2, %s718_s9  ;;  %s228_s28 = scalar_lea.vmem [#allocation6], %s698_s27 }
  0x30   : > { %s241_s29 = sshll.u32 %s228_s28, 4  ;;  %s940_s11 = smov [#allocation6]   ;;  %s242_s29 = int_to_ptr.vmem [resolvable:$true] %s241_s29 }
  0x31   : > { %s865_s5 = scalar_lea.vmem %s242_s29, 128  ;;  %s870_s4 = sshll.u32 %s940_s11, 4  ;;  %s871_s4 = int_to_ptr.vmem [resolvable:$false] %s870_s4 }
  0x32   : > { %p866_p3 = scmp.ne.s32.totalorder %s242_s29, %s865_s5  ;;  %s872_s6 = scalar_lea.vmem %s871_s4, 256 }
  0x33   : > { %p873_p8 = scmp.lt.s32.totalorder %s242_s29, %s871_s4  ;;  %p874_p12 = scmp.lt.s32.totalorder %s872_s6, %s865_s5 }
  0x34   : > { %p868_p4 = pnand %p866_p3, %p798_p11 }
  0x35   : > { %p875_p13 = por %p874_p12, %p873_p8 }
  0x36   : > { %p869_p5 = pneg %p868_p4 }
  0x38   : > { %p876_p10 = pnand %p875_p13, %p869_p5 }
  0x3a   : > { %879 = shalt.err (!%p876_p10)
}
  0x3b   : > { %736 = dma.hbm_to_vmem [thread:$0]  (!%p1019_p9), %s239_s20, 128, %s242_s29, %s1030_s7  }
  0x3c   : > { %250 = sbr.rel (%p1043_p6) target bundleno = 353 (0x161), region = 32  ;;  %s252_s27 = sand.u32 (!%p1043_p6), 1, %s918_s13  }
  0x3d   : > { %s253_s30 = scalar_lea.sflag (!%p1043_p6), [#allocation3], %s252_s27 }
  0x41   : > { %905 = dma.done.wait (%p1005_p7), %s253_s30, 128  }
  0x42   : > { %907 = vsyncadd (%p1005_p7), %s253_s30, 4294967168  ;;  %s261_s8 = sand.u32 1, %s694_s18   ;;  %s709_s9 = sshll.u32 %s252_s27, 4 }
  0x43   : > { %s262_s26 = scalar_lea.sflag [#allocation5], %s261_s8  ;;  %s265_s10 = scalar_lea.vmem [#allocation4], %s709_s9 }
  0x44   : > { %909 = dma.done.wait (%p1005_p7), %s262_s26, 384  }
  0x45   : > { %911 = vsyncadd (%p1005_p7), %s262_s26, 4294966912  ;;  %v941_v0 = vmov 0.0   ;;  %s942_s7 = smov 127   ;;  %v347_v1 = vld [vmem:[%s265_s10] sm:$0xff]  ;;  %s943_s21 = smov 1   ;;  %v348_v2 = vld [vmem:[%s265_s10 + $0x8] sm:$0xff] }
  0x46   : > { %792 = vrot.lane.b32.xlu0 %v941_v0, %s942_s7  ;;  %372 = vrot.lane.b32.xlu1 %v347_v1, %s943_s21  ;;  %vm382_vm0 = vcmask 7168   ;;  %vm365_vm1 = vcmask 121856   ;;  %vm399_vm2 = vcmask 1040384   ;;  %vm416_vm3 = vcmask 1046528   ;;  %p321_p7 = scmp.lt.s32.totalorder %s926_s15, 1 }
  0x47   : > { %v434_v43 = vmul.f32 3.0, %v347_v1  ;;  %v435_v52 = vmul.f32 3.0, %v348_v2  ;;  %vm549_vm4 = vcmask 130048  }
  0x48   : > { %s1166_s15 = smov (!%p321_p7, %s926_s15), 1 }
  0x49   : > { %s719_s18 = sshll.u32 %s1166_s15, 4 }
  0x4a   : > { %355 = vrot.lane.b32.xlu0 %v347_v1, %s942_s7  ;;  %374 = vrot.lane.b32.xlu1 %v348_v2, %s943_s21  ;;  %s328_s24 = scalar_lea.vmem %s1154_s3, %s719_s18 }
  0x4e   : > { %357 = vrot.lane.b32.xlu0 %v348_v2, %s942_s7  ;;  %370 = vrot.lane.b32.xlu1 %v941_v0, %s943_s21 }
  0x52   : > { %376 = vrot.lane.b32.xlu0 %v941_v0, %s943_s21 }
  0xb8   : > { %v793_v3 = vpop.permute.xlu0 %792  ;;  %v373_v4 = vpop.permute.xlu1 %372 }
  0xb9   : > { %v384_v6 = vsel %vm382_vm0, 0.0, %v373_v4  ;;  %v795_v11 = vunpack.i.h.bf16 %v793_v3  ;;  %v794_v12 = vunpack.i.l.bf16 %v793_v3 }
  0xbb   : > { %v366_v20 = vsel %vm365_vm1, %v794_v12, 0.0  ;;  %v369_v22 = vsel %vm365_vm1, %v795_v11, 0.0 }
  0xbc   : > { %v356_v5 = vpop.permute.xlu0 %355  ;;  %v375_v9 = vpop.permute.xlu1 %374 }
  0xbd   : > { %v367_v7 = vsel %vm365_vm1, %v356_v5, 0.0  ;;  %v385_v13 = vsel %vm382_vm0, 0.0, %v375_v9 }
  0xbe   : > { %v388_v8 = vadd.f32 %v384_v6, %v367_v7 }
  0xc0   : > { %v358_v10 = vpop.permute.xlu0 %357  ;;  %v392_v16 = vadd.f32 %v388_v8, %v347_v1  ;;  %v371_v18 = vpop.permute.xlu1 %370 }
  0xc1   : > { %v368_v14 = vsel %vm365_vm1, %v358_v10, 0.0  ;;  %v383_v21 = vsel %vm382_vm0, 0.0, %v371_v18 }
  0xc2   : > { %v389_v15 = vadd.f32 %v385_v13, %v368_v14  ;;  %v387_v25 = vadd.f32 %v383_v21, %v366_v20  ;;  %v401_v27 = vrot.slane %v392_v16, 7  ;;  %v418_v33 = vrot.slane %v392_v16, 1 }
  0xc4   : > { %v393_v17 = vadd.f32 %v389_v15, %v348_v2  ;;  %v377_v19 = vpop.permute.xlu0 %376  ;;  %v400_v28 = vrot.slane %v387_v25, 7  ;;  %v417_v29 = vrot.slane %v387_v25, 1 }
  0xc5   : > { %v386_v23 = vsel %vm382_vm0, 0.0, %v377_v19 }
  0xc6   : > { %v403_v24 = vrot.slane %v393_v17, 7  ;;  %v390_v26 = vadd.f32 %v386_v23, %v369_v22  ;;  %v420_v32 = vrot.slane %v393_v17, 1  ;;  %v411_v34 = vsel %vm399_vm2, 0.0, %v400_v28 }
  0xc7   : > { %v412_v37 = vadd.f32 %v411_v34, %v387_v25  ;;  %v402_v39 = vsel %vm399_vm2, %v400_v28, %v401_v27  ;;  %v419_v40 = vsel %vm416_vm3, %v417_v29, %v418_v33 }
  0xc8   : > { %v405_v30 = vrot.slane %v390_v26, 7  ;;  %v422_v31 = vrot.slane %v390_v26, 1  ;;  %v404_v36 = vsel %vm399_vm2, %v401_v27, %v403_v24  ;;  %v413_v42 = vadd.f32 %v402_v39, %v392_v16 }
  0xc9   : > { %v429_v44 = vadd.f32 %v419_v40, %v412_v37  ;;  %v421_v46 = vsel %vm416_vm3, %v418_v33, %v420_v32  ;;  %v414_v47 = vadd.f32 %v404_v36, %v393_v17 }
  0xca   : > { %v406_v35 = vsel %vm399_vm2, %v403_v24, %v405_v30  ;;  %v428_v41 = vsel %vm416_vm3, %v422_v31, 0.0  ;;  %v430_v48 = vadd.f32 %v421_v46, %v413_v42  ;;  %v423_v49 = vsel %vm416_vm3, %v420_v32, %v422_v31 }
  0xcb   : > { %v415_v38 = vadd.f32 %v406_v35, %v390_v26  ;;  %445 = vrot.lane.b32.xlu1 %v429_v44, %s942_s7  ;;  %v431_v51 = vadd.f32 %v423_v49, %v414_v47  ;;  %v481_v57 = vmul.f32 2.0, %v429_v44 }
  0xcc   : > { %v438_v50 = vadd.f32 %v434_v43, %v430_v48 }
  0xcd   : > { %v432_v45 = vadd.f32 %v428_v41, %v415_v38  ;;  %v439_v53 = vadd.f32 %v435_v52, %v431_v51 }
  0xce   : > { %v482_v63 = vmul.f32 2.0, %v438_v50 }
  0xcf   : > { %451 = vrot.lane.b32.xlu0 %v432_v45, %s942_s7  ;;  %461 = vrot.lane.b32.xlu1 %v429_v44, %s943_s21  ;;  %v484_v6 = vmul.f32 2.0, %v432_v45  ;;  %v483_v9 = vmul.f32 2.0, %v439_v53 }
  0xd3   : > { %447 = vrot.lane.b32.xlu0 %v438_v50, %s942_s7  ;;  %449 = vrot.lane.b32.xlu1 %v439_v53, %s942_s7 }
  0xd7   : > { %463 = vrot.lane.b32.xlu0 %v438_v50, %s943_s21  ;;  %465 = vrot.lane.b32.xlu1 %v439_v53, %s943_s21 }
  0xdb   : > { %467 = vrot.lane.b32.xlu0 %v432_v45, %s943_s21 }
 0x13d   : > { %v446_v54 = vpop.permute.xlu1 %445 }
 0x13e   : > { %v457_v56 = vsel %vm365_vm1, %v446_v54, 0.0 }
 0x13f   : > { %v485_v62 = vadd.f32 %v481_v57, %v457_v56 }
 0x141   : > { %v452_v55 = vpop.permute.xlu0 %451  ;;  %v462_v58 = vpop.permute.xlu1 %461 }
 0x142   : > { %v473_v60 = vsel %vm382_vm0, 0.0, %v462_v58  ;;  %v460_v0 = vsel %vm365_vm1, %v452_v55, 0.0 }
 0x143   : > { %v477_v1 = vsub.f32 %v457_v56, %v473_v60  ;;  %v489_v2 = vadd.f32 %v485_v62, %v473_v60  ;;  %v488_v12 = vadd.f32 %v484_v6, %v460_v0 }
 0x145   : > { %v448_v59 = vpop.permute.xlu0 %447  ;;  %v450_v4 = vpop.permute.xlu1 %449  ;;  %v496_v13 = vrot.slane %v477_v1, 7  ;;  %v528_v14 = vrot.slane %v489_v2, 7 }
 0x146   : > { %v458_v61 = vsel %vm365_vm1, %v448_v59, 0.0  ;;  %v459_v7 = vsel %vm365_vm1, %v450_v4, 0.0 }
 0x147   : > { %v486_v3 = vadd.f32 %v482_v63, %v458_v61  ;;  %v487_v15 = vadd.f32 %v483_v9, %v459_v7 }
 0x149   : > { %v464_v5 = vpop.permute.xlu0 %463  ;;  %v466_v17 = vpop.permute.xlu1 %465 }
 0x14a   : > { %v474_v8 = vsel %vm382_vm0, 0.0, %v464_v5  ;;  %v475_v21 = vsel %vm382_vm0, 0.0, %v466_v17 }
 0x14b   : > { %v478_v10 = vsub.f32 %v458_v61, %v474_v8  ;;  %v490_v11 = vadd.f32 %v486_v3, %v474_v8  ;;  %v479_v24 = vsub.f32 %v459_v7, %v475_v21  ;;  %v491_v25 = vadd.f32 %v487_v15, %v475_v21 }
 0x14d   : > { %v497_v16 = vrot.slane %v478_v10, 7  ;;  %v468_v18 = vpop.permute.xlu0 %467  ;;  %v503_v19 = vmul.f32 2.0, %v478_v10  ;;  %v529_v20 = vrot.slane %v490_v11, 7  ;;  %v508_v27 = vrot.slane %v478_v10, 1 }
 0x14e   : > { %v476_v22 = vsel %vm382_vm0, 0.0, %v468_v18  ;;  %v520_v28 = vrot.slane %v490_v11, 1  ;;  %v499_v31 = vrot.slane %v479_v24, 7  ;;  %v504_v32 = vmul.f32 2.0, %v479_v24 }
 0x14f   : > { %v498_v23 = vsel %vm399_vm2, %v496_v13, %v497_v16  ;;  %v480_v26 = vsub.f32 %v460_v0, %v476_v22  ;;  %v530_v29 = vsel %vm399_vm2, %v528_v14, %v529_v20  ;;  %v492_v30 = vadd.f32 %v488_v12, %v476_v22 }
 0x150   : > { %v509_v33 = vrot.slane %v479_v24, 1  ;;  %v521_v34 = vrot.slane %v491_v25, 1  ;;  %v505_v35 = vadd.f32 %v503_v19, %v498_v23  ;;  %v531_v36 = vrot.slane %v491_v25, 7 }
 0x151   : > { %v511_v37 = vrot.slane %v480_v26, 1  ;;  %v523_v38 = vrot.slane %v492_v30, 1  ;;  %v500_v39 = vsel %vm399_vm2, %v497_v16, %v499_v31 }
 0x152   : > { %v510_v40 = vsel %vm416_vm3, %v508_v27, %v509_v33  ;;  %v522_v41 = vsel %vm416_vm3, %v520_v28, %v521_v34  ;;  %v506_v42 = vadd.f32 %v504_v32, %v500_v39  ;;  %v532_v44 = vsel %vm399_vm2, %v529_v20, %v531_v36 }
 0x153   : > { %v515_v43 = vadd.f32 %v510_v40, %v505_v35  ;;  %v535_v45 = vsub.f32 %v522_v41, %v530_v29  ;;  %v512_v46 = vsel %vm416_vm3, %v509_v33, %v511_v37  ;;  %v524_v47 = vsel %vm416_vm3, %v521_v34, %v523_v38 }
 0x154   : > { %v516_v50 = vadd.f32 %v512_v46, %v506_v42  ;;  %v536_v51 = vsub.f32 %v524_v47, %v532_v44 }
 0x155   : > { %v537_v48 = vmul.f32 %v515_v43, %v515_v43  ;;  %v539_v49 = vmul.f32 %v535_v45, %v535_v45 }
 0x156   : > { %v538_v53 = vmul.f32 %v516_v50, %v516_v50  ;;  %v540_v54 = vmul.f32 %v536_v51, %v536_v51 }
 0x157   : > { %v541_v52 = vadd.f32 %v539_v49, %v537_v48 }
 0x158   : > { %v542_v56 = vadd.f32 %v540_v54, %v538_v53 }
 0x159   : > { %v543_v55 = vmul.f32 6.1035156e-05, %v541_v52 }
 0x15a   : > { %v544_v58 = vmul.f32 6.1035156e-05, %v542_v56 }
 0x15b   : > { %v545_v57 = vmax.f32 %v543_v55, 0.0 }
 0x15c   : > { %v546_v60 = vmax.f32 %v544_v58, 0.0 }
 0x15d   : > { %v547_v59 = vmin.f32 %v545_v57, 1.0 }
 0x15e   : > { %v548_v61 = vmin.f32 %v546_v60, 1.0 }
 0x15f   : > { %550 = vst.msk [vmem:[%s328_s24] sm:$0xff] %vm549_vm4, %v547_v59 }
 0x160   : > { %551 = vst.msk [vmem:[%s328_s24 + $0x8] sm:$0xff] %vm549_vm4, %v548_v61 }
 0x161 PF: > { %s19_s17 = sadd.s32 1, %s934_s17   ;;  %s1158_s12 = smov %s918_s13 }
 0x162   : > { %p16_p9 = scmp.ge.s32.totalorder %s19_s17, 4   ;;  %s1159_s13 = smov %s922_s14 }
 0x163   : > { %s1160_s14 = smov %s1011_s23  ;;  %s1161_s15 = smov %s930_s16 }
 0x164   : > { %s1162_s16 = smov %s1164_s19  ;;  %18 = sbr.rel (!%p16_p9) target bundleno = 6 (0x6), region = 96 }
 0x169   :  { %582 = vsyncpa [#allocation3], 1 }
 0x16a   :  { %584 = vsyncpa [#allocation3 + $0x1], 1 }
 0x16b   :  { %585 = vsyncpa [#allocation5], 1 }
 0x16c   :  { %587 = vsyncpa [#allocation5 + $0x1], 1 }

</bundles_post_ra>
